<compile_context>
chip_gen: v7x
topology: tpu7x:2x2x1
jax: 0.10.0
libtpu: 0.0.40
codegen_flags: <defaults>
</compile_context>

<pallas_src>
import functools
import numpy as np
import jax
import jax.numpy as jnp
from jax.experimental import pallas as pl
from jax.experimental.pallas import tpu as pltpu


def _ru(a, m):
    return -(-a // m) * m


# ---------------------------- fused Pallas kernel ----------------------------

def _encoder_fused_kernel(x_ref, wenc_ref, bc_ref, wdec_ref, bt_ref,
                          yv_ref, pv_ref, o_ref,
                          imcol, y_buf, hwork, p_buf, u_buf,
                          *, k, Wp, RC, WH, POFF, CinP, CoutP):
    """One batch image per invocation.

    x_ref   : (1, CinP, FX)       input embedded in the padded frame (channels on sublanes)
    wenc_ref: (CoutP, k*k*CinP)   im2col-ordered conv weights
    wdec_ref: (CinP,  k*k*CoutP)  im2col-ordered, spatially flipped transposed-conv weights
    bc_ref  : (CoutP, 1), bt_ref: (CinP, 1) biases
    yv_ref/pv_ref : (1, RC) validity masks of conv-output / pooled frame positions
    o_ref   : (1, CinP, RC) decoder output frame (lane-dense)
    imcol   : (k*k*max(CinP,CoutP), RC) im2col staging, reused by both matmuls
    y_buf/u_buf : (CoutP, RC+TPAD) conv-output / unpooled frames
    hwork   : (CoutP, WH) separable-pool temp
    p_buf   : (CoutP, POFF+RC) masked pooled map with +inf head
    """
    f32 = jnp.float32
    kk = k * k
    HOFF = (k - 1) * Wp

    # ---- init ONLY the padding regions (interiors fully overwritten below)
    y_buf[:, RC:] = jnp.zeros((CoutP, y_buf.shape[1] - RC), f32)
    u_buf[:, RC:] = jnp.zeros((CoutP, u_buf.shape[1] - RC), f32)
    p_buf[:, 0:POFF] = jnp.full((CoutP, POFF), jnp.inf, f32)

    # ---- encoder Conv2d: fused im2col staging + ONE MXU matmul (K = k*k*CinP)
    for idx in range(kk):
        s = (idx // k) * Wp + (idx % k)
        imcol[idx * CinP:(idx + 1) * CinP, :] = x_ref[0, :, s:s + RC]
    y = jnp.dot(wenc_ref[...], imcol[0:kk * CinP, :],
                preferred_element_type=f32) + bc_ref[...]
    y_buf[:, 0:RC] = y

    # ---- MaxPool2d(k, stride=1), separable: k horizontal maxes then k vertical
    hmax = y_buf[:, 0:WH]
    for dj in range(1, k):
        hmax = jnp.maximum(hmax, y_buf[:, dj:dj + WH])
    hwork[...] = hmax
    pooled = hwork[:, 0:RC]
    for di in range(1, k):
        pooled = jnp.maximum(pooled, hwork[:, di * Wp:di * Wp + RC])
    # invalid pooled positions must not lower the unpool min
    p_buf[:, POFF:POFF + RC] = jnp.where(pv_ref[...] > 0.5, pooled, jnp.inf)

    # ---- MaxUnpool2d(indices) via mask identity; separable min over containing windows
    hmin = p_buf[:, POFF - HOFF:POFF - HOFF + WH]
    for dj in range(1, k):
        hmin = jnp.minimum(hmin, p_buf[:, POFF - HOFF - dj:POFF - HOFF - dj + WH])
    hwork[...] = hmin
    minp = hwork[:, HOFF:HOFF + RC]
    for di in range(1, k):
        minp = jnp.minimum(minp, hwork[:, HOFF - di * Wp:HOFF - di * Wp + RC])
    keep = (yv_ref[...] > 0.5) & (y >= minp)
    u_buf[:, 0:RC] = jnp.where(keep, y, jnp.zeros((CoutP, RC), f32))

    # ---- decoder ConvTranspose2d == conv(zero-padded u, flipped kernel): ONE matmul
    for idx in range(kk):
        s = (idx // k) * Wp + (idx % k)
        imcol[idx * CoutP:(idx + 1) * CoutP, :] = u_buf[:, s:s + RC]
    out = jnp.dot(wdec_ref[...], imcol[0:kk * CoutP, :],
                  preferred_element_type=f32) + bt_ref[...]
    o_ref[0] = out


# ---------------------------- wrapper ----------------------------

def encoder_forward(x, params, k):
    """Forward pass of Encoder (stride=1, padding=0).  x: (N, Cin, H, W) NCHW."""
    Wc, bc, Wt, bt = params["Wc"], params["bc"], params["Wt"], params["bt"]
    N, Cin, H, W = x.shape
    Cout = Wc.shape[0]

    Hp, Wp = H + k - 1, W + k - 1          # common padded frame for x / y / u / out
    Rp = Hp * Wp                           # flattened frame size
    SH = (k - 1) * Wp + (k - 1)            # largest flat window shift
    RC = _ru(Rp, 128)                      # lane-dense compute / output width
    TPAD = _ru(SH, 128)                    # 128-aligned per-frame tail slack
    FX = RC + TPAD                         # input frame stride per image (128-mult)
    POFF = TPAD                            # +inf head of the pooled buffer
    WH = RC + (k - 1) * Wp                 # width of the horizontal-pass temp
    CinP, CoutP = _ru(Cin, 8), _ru(Cout, 8)
    Cmax = max(CinP, CoutP)

    H1, W1 = H - k + 1, W - k + 1          # conv output size
    H2, W2 = H1 - k + 1, W1 - k + 1        # pool output size

    # --- embed x at frame offset (k-1, k-1), channels on sublanes, lane-dense frame
    xf = jnp.pad(x, ((0, 0), (0, CinP - Cin), (k - 1, 0), (k - 1, 0)))
    xf = xf.reshape(N, CinP, Rp)
    xf = jnp.pad(xf, ((0, 0), (0, 0), (0, FX - Rp)))                 # (N, CinP, FX)

    # --- im2col-ordered weight matrices (tiny one-time prep)
    wenc = jnp.pad(Wc, ((0, CoutP - Cout), (0, CinP - Cin), (0, 0), (0, 0)))
    wenc2 = wenc.transpose(0, 2, 3, 1).reshape(CoutP, k * k * CinP)   # [co, idx*CinP+ci]
    wdec = jnp.pad(Wt[:, :, ::-1, ::-1].transpose(1, 2, 3, 0),        # flipped kernel
                   ((0, CinP - Cin), (0, 0), (0, 0), (0, CoutP - Cout)))
    wdec2 = wdec.reshape(CinP, k * k * CoutP)                         # [ci, idx*CoutP+co]
    bc2 = jnp.pad(bc, (0, CoutP - Cout)).reshape(CoutP, 1)
    bt2 = jnp.pad(bt, (0, CinP - Cin)).reshape(CinP, 1)

    # --- validity masks over the lane-dense frame (trace-time numpy constants)
    rr = np.arange(RC)
    pr, qc = rr // Wp, rr % Wp
    infr = rr < Rp
    yv = ((infr & (pr >= k - 1) & (pr < k - 1 + H1) & (qc >= k - 1) & (qc < k - 1 + W1))
          .astype(np.float32)[None, :])
    pv = ((infr & (pr >= k - 1) & (pr < k - 1 + H2) & (qc >= k - 1) & (qc < k - 1 + W2))
          .astype(np.float32)[None, :])

    kern = functools.partial(_encoder_fused_kernel, k=k, Wp=Wp, RC=RC, WH=WH,
                             POFF=POFF, CinP=CinP, CoutP=CoutP)
    out_flat = pl.pallas_call(
        kern,
        grid=(N,),   # one image per step; N=2 -> one per v7x TensorCore
        in_specs=[
            pl.BlockSpec((1, CinP, FX), lambda n: (n, 0, 0)),          # x frame
            pl.BlockSpec((CoutP, k * k * CinP), lambda n: (0, 0)),     # enc weights
            pl.BlockSpec((CoutP, 1), lambda n: (0, 0)),                # enc bias
            pl.BlockSpec((CinP, k * k * CoutP), lambda n: (0, 0)),     # dec weights
            pl.BlockSpec((CinP, 1), lambda n: (0, 0)),                 # dec bias
            pl.BlockSpec((1, RC), lambda n: (0, 0)),                   # conv-valid mask
            pl.BlockSpec((1, RC), lambda n: (0, 0)),                   # pool-valid mask
        ],
        out_specs=pl.BlockSpec((1, CinP, RC), lambda n: (n, 0, 0)),
        out_shape=jax.ShapeDtypeStruct((N, CinP, RC), jnp.float32),
        scratch_shapes=[
            pltpu.VMEM((k * k * Cmax, RC), jnp.float32),   # im2col staging (reused)
            pltpu.VMEM((CoutP, RC + TPAD), jnp.float32),   # conv-output frame
            pltpu.VMEM((CoutP, WH), jnp.float32),          # separable pool/min temp
            pltpu.VMEM((CoutP, POFF + RC), jnp.float32),   # masked pooled (+inf head)
            pltpu.VMEM((CoutP, RC + TPAD), jnp.float32),   # unpooled frame
        ],
        compiler_params=pltpu.CompilerParams(
            dimension_semantics=("parallel",)),
    )(xf, wenc2, bc2, wdec2, bt2, jnp.asarray(yv), jnp.asarray(pv))

    # lane-dense frame -> NCHW: tiny slice + free reshape
    return out_flat[:, :Cin, :Rp].reshape(N, Cin, Hp, Wp)[:, :, :H, :W]


# ---------------------------- pure reference (for verification) ----------------------------

def reference_forward(x, params, k):
    Wc, bc, Wt, bt = params["Wc"], params["bc"], params["Wt"], params["bt"]
    y = jax.lax.conv_general_dilated(
        x, Wc, window_strides=(1, 1), padding="VALID",
        dimension_numbers=("NCHW", "OIHW", "NCHW")) + bc[None, :, None, None]
    yn = np.asarray(y)
    N, C, H1, W1 = yn.shape
    H2, W2 = H1 - k + 1, W1 - k + 1
    # maxpool(return_indices) + maxunpool -> scatter of window maxima
    un = np.zeros_like(yn)
    for n in range(N):
        for c in range(C):
            for i in range(H2):
                for j in range(W2):
                    win = yn[n, c, i:i + k, j:j + k]
                    ai, aj = np.unravel_index(np.argmax(win), win.shape)
                    un[n, c, i + ai, j + aj] = win[ai, aj]
    # ConvTranspose2d: each input pixel scatters a weighted kernel
    Wtn = np.asarray(Wt)
    Cin = Wtn.shape[1]
    out = np.zeros((N, Cin, H1 + k - 1, W1 + k - 1), np.float32)
    for n in range(N):
        for co in range(C):
            for i in range(H1):
                for j in range(W1):
                    out[n, :, i:i + k, j:j + k] += un[n, co, i, j] * Wtn[co]
    out += np.asarray(bt)[None, :, None, None]
    return out


# ---------------------------- main ----------------------------

if __name__ == "__main__":
    N, Cin, Cout, H, W, k = 2, 4, 8, 16, 16, 3

    key = jax.random.PRNGKey(0)
    kx, k1, k2, k3, k4 = jax.random.split(key, 5)
    x = jax.random.normal(kx, (N, Cin, H, W), jnp.float32)

    # deterministic synthetic parameters (shapes match nn.Conv2d / nn.ConvTranspose2d)
    params = {
        "Wc": jax.random.normal(k1, (Cout, Cin, k, k), jnp.float32) / np.sqrt(Cin * k * k),
        "bc": jax.random.normal(k2, (Cout,), jnp.float32) * 0.05,
        "Wt": jax.random.normal(k3, (Cout, Cin, k, k), jnp.float32) / np.sqrt(Cout * k * k),
        "bt": jax.random.normal(k4, (Cin,), jnp.float32) * 0.05,
    }

    fwd = jax.jit(functools.partial(encoder_forward, k=k))
    out = jax.block_until_ready(fwd(x, params))
    assert out.shape == (N, Cin, H, W), out.shape

    ref = reference_forward(x, params, k)
    np.testing.assert_allclose(np.asarray(out), ref, rtol=1e-3, atol=1e-3)

    print("KERNEL_OK")
</pallas_src>

<mosaic_0001>
module attributes {stable_mosaic.version = 11 : i64} {
  func.func @_encoder_fused_kernel(%arg0: i32, %arg1: memref<1x8x512xf32, #tpu.memory_space<vmem>>, %arg2: memref<8x72xf32, #tpu.memory_space<vmem>>, %arg3: memref<8x1xf32, #tpu.memory_space<vmem>>, %arg4: memref<8x72xf32, #tpu.memory_space<vmem>>, %arg5: memref<8x1xf32, #tpu.memory_space<vmem>>, %arg6: memref<1x384xf32, #tpu.memory_space<vmem>>, %arg7: memref<1x384xf32, #tpu.memory_space<vmem>>, %arg8: memref<1x8x384xf32, #tpu.memory_space<vmem>>, %arg9: memref<72x384xf32, #tpu.memory_space<vmem>>, %arg10: memref<8x512xf32, #tpu.memory_space<vmem>>, %arg11: memref<8x420xf32, #tpu.memory_space<vmem>>, %arg12: memref<8x512xf32, #tpu.memory_space<vmem>>, %arg13: memref<8x512xf32, #tpu.memory_space<vmem>>) attributes {dimension_semantics = [#tpu.dimension_semantics<parallel>], iteration_bounds = array<i64: 2>, scalar_prefetch = 0 : i64, scratch_operands = 5 : i64, tpu.core_type = #tpu.core_type<tc>, window_params = [{transform_indices = @transform_0, window_bounds = array<i64: 1, 8, 512>}, {pipeline_mode = #tpu.pipeline_mode<synchronous>, transform_indices = @transform_1, window_bounds = array<i64: 8, 72>}, {pipeline_mode = #tpu.pipeline_mode<synchronous>, transform_indices = @transform_2, window_bounds = array<i64: 8, 1>}, {pipeline_mode = #tpu.pipeline_mode<synchronous>, transform_indices = @transform_3, window_bounds = array<i64: 8, 72>}, {pipeline_mode = #tpu.pipeline_mode<synchronous>, transform_indices = @transform_4, window_bounds = array<i64: 8, 1>}, {pipeline_mode = #tpu.pipeline_mode<synchronous>, transform_indices = @transform_5, window_bounds = array<i64: 1, 384>}, {pipeline_mode = #tpu.pipeline_mode<synchronous>, transform_indices = @transform_6, window_bounds = array<i64: 1, 384>}, {transform_indices = @transform_7, window_bounds = array<i64: 1, 8, 384>}]} {
    %cst = arith.constant 0.000000e+00 : f32
    %0 = vector.broadcast %cst : f32 to vector<8x128xf32>
    %c0 = arith.constant 0 : index
    %c384 = arith.constant 384 : index
    %1 = vector.load %arg10[%c0, %c384] : memref<8x512xf32, #tpu.memory_space<vmem>>, vector<8x128xf32>
    tpu.vector_store %arg10[%c0, %c384], %0 {strides = array<i32>} : memref<8x512xf32, #tpu.memory_space<vmem>>, vector<8x128xf32>,
    %cst_0 = arith.constant 0.000000e+00 : f32
    %2 = vector.broadcast %cst_0 : f32 to vector<8x128xf32>
    %c0_1 = arith.constant 0 : index
    %c384_2 = arith.constant 384 : index
    %3 = vector.load %arg13[%c0_1, %c384_2] : memref<8x512xf32, #tpu.memory_space<vmem>>, vector<8x128xf32>
    tpu.vector_store %arg13[%c0_1, %c384_2], %2 {strides = array<i32>} : memref<8x512xf32, #tpu.memory_space<vmem>>, vector<8x128xf32>,
    %cst_3 = arith.constant 0x7F800000 : f32
    %4 = vector.broadcast %cst_3 : f32 to vector<8x128xf32>
    %c0_4 = arith.constant 0 : index
    %c0_5 = arith.constant 0 : index
    %5 = vector.load %arg12[%c0_4, %c0_5] : memref<8x512xf32, #tpu.memory_space<vmem>>, vector<8x128xf32>
    tpu.vector_store %arg12[%c0_4, %c0_5], %4 {strides = array<i32>} : memref<8x512xf32, #tpu.memory_space<vmem>>, vector<8x128xf32>,
    %c0_6 = arith.constant 0 : index
    %c0_7 = arith.constant 0 : index
    %c0_8 = arith.constant 0 : index
    %6 = vector.load %arg1[%c0_6, %c0_7, %c0_8] : memref<1x8x512xf32, #tpu.memory_space<vmem>>, vector<1x8x384xf32>
    %7 = vector.shape_cast %6 : vector<1x8x384xf32> to vector<8x384xf32>
    %c0_9 = arith.constant 0 : index
    %c0_10 = arith.constant 0 : index
    %8 = vector.load %arg9[%c0_9, %c0_10] : memref<72x384xf32, #tpu.memory_space<vmem>>, vector<8x384xf32>
    tpu.vector_store %arg9[%c0_9, %c0_10], %7 {strides = array<i32>} : memref<72x384xf32, #tpu.memory_space<vmem>>, vector<8x384xf32>,
    %c0_11 = arith.constant 0 : index
    %c0_12 = arith.constant 0 : index
    %c1 = arith.constant 1 : index
    %9 = vector.load %arg1[%c0_11, %c0_12, %c1] : memref<1x8x512xf32, #tpu.memory_space<vmem>>, vector<1x8x384xf32>
    %10 = vector.shape_cast %9 : vector<1x8x384xf32> to vector<8x384xf32>
    %c8 = arith.constant 8 : index
    %c0_13 = arith.constant 0 : index
    %11 = vector.load %arg9[%c8, %c0_13] : memref<72x384xf32, #tpu.memory_space<vmem>>, vector<8x384xf32>
    tpu.vector_store %arg9[%c8, %c0_13], %10 {strides = array<i32>} : memref<72x384xf32, #tpu.memory_space<vmem>>, vector<8x384xf32>,
    %c0_14 = arith.constant 0 : index
    %c0_15 = arith.constant 0 : index
    %c2 = arith.constant 2 : index
    %12 = vector.load %arg1[%c0_14, %c0_15, %c2] : memref<1x8x512xf32, #tpu.memory_space<vmem>>, vector<1x8x384xf32>
    %13 = vector.shape_cast %12 : vector<1x8x384xf32> to vector<8x384xf32>
    %c16 = arith.constant 16 : index
    %c0_16 = arith.constant 0 : index
    %14 = vector.load %arg9[%c16, %c0_16] : memref<72x384xf32, #tpu.memory_space<vmem>>, vector<8x384xf32>
    tpu.vector_store %arg9[%c16, %c0_16], %13 {strides = array<i32>} : memref<72x384xf32, #tpu.memory_space<vmem>>, vector<8x384xf32>,
    %c0_17 = arith.constant 0 : index
    %c0_18 = arith.constant 0 : index
    %c18 = arith.constant 18 : index
    %15 = vector.load %arg1[%c0_17, %c0_18, %c18] : memref<1x8x512xf32, #tpu.memory_space<vmem>>, vector<1x8x384xf32>
    %16 = vector.shape_cast %15 : vector<1x8x384xf32> to vector<8x384xf32>
    %c24 = arith.constant 24 : index
    %c0_19 = arith.constant 0 : index
    %17 = vector.load %arg9[%c24, %c0_19] : memref<72x384xf32, #tpu.memory_space<vmem>>, vector<8x384xf32>
    tpu.vector_store %arg9[%c24, %c0_19], %16 {strides = array<i32>} : memref<72x384xf32, #tpu.memory_space<vmem>>, vector<8x384xf32>,
    %c0_20 = arith.constant 0 : index
    %c0_21 = arith.constant 0 : index
    %c19 = arith.constant 19 : index
    %18 = vector.load %arg1[%c0_20, %c0_21, %c19] : memref<1x8x512xf32, #tpu.memory_space<vmem>>, vector<1x8x384xf32>
    %19 = vector.shape_cast %18 : vector<1x8x384xf32> to vector<8x384xf32>
    %c32 = arith.constant 32 : index
    %c0_22 = arith.constant 0 : index
    %20 = vector.load %arg9[%c32, %c0_22] : memref<72x384xf32, #tpu.memory_space<vmem>>, vector<8x384xf32>
    tpu.vector_store %arg9[%c32, %c0_22], %19 {strides = array<i32>} : memref<72x384xf32, #tpu.memory_space<vmem>>, vector<8x384xf32>,
    %c0_23 = arith.constant 0 : index
    %c0_24 = arith.constant 0 : index
    %c20 = arith.constant 20 : index
    %21 = vector.load %arg1[%c0_23, %c0_24, %c20] : memref<1x8x512xf32, #tpu.memory_space<vmem>>, vector<1x8x384xf32>
    %22 = vector.shape_cast %21 : vector<1x8x384xf32> to vector<8x384xf32>
    %c40 = arith.constant 40 : index
    %c0_25 = arith.constant 0 : index
    %23 = vector.load %arg9[%c40, %c0_25] : memref<72x384xf32, #tpu.memory_space<vmem>>, vector<8x384xf32>
    tpu.vector_store %arg9[%c40, %c0_25], %22 {strides = array<i32>} : memref<72x384xf32, #tpu.memory_space<vmem>>, vector<8x384xf32>,
    %c0_26 = arith.constant 0 : index
    %c0_27 = arith.constant 0 : index
    %c36 = arith.constant 36 : index
    %24 = vector.load %arg1[%c0_26, %c0_27, %c36] : memref<1x8x512xf32, #tpu.memory_space<vmem>>, vector<1x8x384xf32>
    %25 = vector.shape_cast %24 : vector<1x8x384xf32> to vector<8x384xf32>
    %c48 = arith.constant 48 : index
    %c0_28 = arith.constant 0 : index
    %26 = vector.load %arg9[%c48, %c0_28] : memref<72x384xf32, #tpu.memory_space<vmem>>, vector<8x384xf32>
    tpu.vector_store %arg9[%c48, %c0_28], %25 {strides = array<i32>} : memref<72x384xf32, #tpu.memory_space<vmem>>, vector<8x384xf32>,
    %c0_29 = arith.constant 0 : index
    %c0_30 = arith.constant 0 : index
    %c37 = arith.constant 37 : index
    %27 = vector.load %arg1[%c0_29, %c0_30, %c37] : memref<1x8x512xf32, #tpu.memory_space<vmem>>, vector<1x8x384xf32>
    %28 = vector.shape_cast %27 : vector<1x8x384xf32> to vector<8x384xf32>
    %c56 = arith.constant 56 : index
    %c0_31 = arith.constant 0 : index
    %29 = vector.load %arg9[%c56, %c0_31] : memref<72x384xf32, #tpu.memory_space<vmem>>, vector<8x384xf32>
    tpu.vector_store %arg9[%c56, %c0_31], %28 {strides = array<i32>} : memref<72x384xf32, #tpu.memory_space<vmem>>, vector<8x384xf32>,
    %c0_32 = arith.constant 0 : index
    %c0_33 = arith.constant 0 : index
    %c38 = arith.constant 38 : index
    %30 = vector.load %arg1[%c0_32, %c0_33, %c38] : memref<1x8x512xf32, #tpu.memory_space<vmem>>, vector<1x8x384xf32>
    %31 = vector.shape_cast %30 : vector<1x8x384xf32> to vector<8x384xf32>
    %c64 = arith.constant 64 : index
    %c0_34 = arith.constant 0 : index
    %32 = vector.load %arg9[%c64, %c0_34] : memref<72x384xf32, #tpu.memory_space<vmem>>, vector<8x384xf32>
    tpu.vector_store %arg9[%c64, %c0_34], %31 {strides = array<i32>} : memref<72x384xf32, #tpu.memory_space<vmem>>, vector<8x384xf32>,
    %c0_35 = arith.constant 0 : index
    %c0_36 = arith.constant 0 : index
    %33 = vector.load %arg2[%c0_35, %c0_36] : memref<8x72xf32, #tpu.memory_space<vmem>>, vector<8x72xf32>
    %c0_37 = arith.constant 0 : index
    %c0_38 = arith.constant 0 : index
    %34 = vector.load %arg9[%c0_37, %c0_38] : memref<72x384xf32, #tpu.memory_space<vmem>>, vector<72x384xf32>
    %cst_39 = arith.constant dense<0.000000e+00> : vector<8x384xf32>
    %35 = tpu.matmul %33, %34, %cst_39 {dimension_numbers = #tpu.dot_dimension_numbers<[1], [0], [0], [1], [0, 0, 1, 1], [], []>} : vector<8x72xf32>, vector<72x384xf32>, vector<8x384xf32> -> vector<8x384xf32>
    %c0_40 = arith.constant 0 : index
    %c0_41 = arith.constant 0 : index
    %36 = vector.load %arg3[%c0_40, %c0_41] : memref<8x1xf32, #tpu.memory_space<vmem>>, vector<8x1xf32>
    %37 = vector.broadcast %36 : vector<8x1xf32> to vector<8x384xf32>
    %38 = arith.addf %35, %37 : vector<8x384xf32>
    %c0_42 = arith.constant 0 : index
    %c0_43 = arith.constant 0 : index
    %39 = vector.load %arg10[%c0_42, %c0_43] : memref<8x512xf32, #tpu.memory_space<vmem>>, vector<8x384xf32>
    tpu.vector_store %arg10[%c0_42, %c0_43], %38 {strides = array<i32>} : memref<8x512xf32, #tpu.memory_space<vmem>>, vector<8x384xf32>,
    %c0_44 = arith.constant 0 : index
    %c0_45 = arith.constant 0 : index
    %40 = vector.load %arg10[%c0_44, %c0_45] : memref<8x512xf32, #tpu.memory_space<vmem>>, vector<8x420xf32>
    %c0_46 = arith.constant 0 : index
    %c1_47 = arith.constant 1 : index
    %41 = vector.load %arg10[%c0_46, %c1_47] : memref<8x512xf32, #tpu.memory_space<vmem>>, vector<8x420xf32>
    %42 = arith.maximumf %40, %41 : vector<8x420xf32>
    %c0_48 = arith.constant 0 : index
    %c2_49 = arith.constant 2 : index
    %43 = vector.load %arg10[%c0_48, %c2_49] : memref<8x512xf32, #tpu.memory_space<vmem>>, vector<8x420xf32>
    %44 = arith.maximumf %42, %43 : vector<8x420xf32>
    %c0_50 = arith.constant 0 : index
    %c0_51 = arith.constant 0 : index
    %45 = vector.load %arg11[%c0_50, %c0_51] : memref<8x420xf32, #tpu.memory_space<vmem>>, vector<8x420xf32>
    tpu.vector_store %arg11[%c0_50, %c0_51], %44 {strides = array<i32>} : memref<8x420xf32, #tpu.memory_space<vmem>>, vector<8x420xf32>,
    %c0_52 = arith.constant 0 : index
    %c0_53 = arith.constant 0 : index
    %46 = vector.load %arg11[%c0_52, %c0_53] : memref<8x420xf32, #tpu.memory_space<vmem>>, vector<8x384xf32>
    %c0_54 = arith.constant 0 : index
    %c18_55 = arith.constant 18 : index
    %47 = vector.load %arg11[%c0_54, %c18_55] : memref<8x420xf32, #tpu.memory_space<vmem>>, vector<8x384xf32>
    %48 = arith.maximumf %46, %47 : vector<8x384xf32>
    %c0_56 = arith.constant 0 : index
    %c36_57 = arith.constant 36 : index
    %49 = vector.load %arg11[%c0_56, %c36_57] : memref<8x420xf32, #tpu.memory_space<vmem>>, vector<8x384xf32>
    %50 = arith.maximumf %48, %49 : vector<8x384xf32>
    %c0_58 = arith.constant 0 : index
    %c0_59 = arith.constant 0 : index
    %51 = vector.load %arg7[%c0_58, %c0_59] : memref<1x384xf32, #tpu.memory_space<vmem>>, vector<1x384xf32>
    %cst_60 = arith.constant 5.000000e-01 : f32
    %52 = vector.broadcast %cst_60 : f32 to vector<1x384xf32>
    %53 = arith.cmpf ogt, %51, %52 : vector<1x384xf32>
    %cst_61 = arith.constant 0x7F800000 : f32
    %54 = vector.shape_cast %53 : vector<1x384xi1> to vector<1x384xi1>
    %55 = vector.broadcast %54 : vector<1x384xi1> to vector<8x384xi1>
    %56 = vector.broadcast %cst_61 : f32 to vector<8x384xf32>
    %57 = arith.select %55, %50, %56 : vector<8x384xi1>, vector<8x384xf32>
    %c0_62 = arith.constant 0 : index
    %c128 = arith.constant 128 : index
    %58 = vector.load %arg12[%c0_62, %c128] : memref<8x512xf32, #tpu.memory_space<vmem>>, vector<8x384xf32>
    tpu.vector_store %arg12[%c0_62, %c128], %57 {strides = array<i32>} : memref<8x512xf32, #tpu.memory_space<vmem>>, vector<8x384xf32>,
    %c0_63 = arith.constant 0 : index
    %c92 = arith.constant 92 : index
    %59 = vector.load %arg12[%c0_63, %c92] : memref<8x512xf32, #tpu.memory_space<vmem>>, vector<8x420xf32>
    %c0_64 = arith.constant 0 : index
    %c91 = arith.constant 91 : index
    %60 = vector.load %arg12[%c0_64, %c91] : memref<8x512xf32, #tpu.memory_space<vmem>>, vector<8x420xf32>
    %61 = arith.minimumf %59, %60 : vector<8x420xf32>
    %c0_65 = arith.constant 0 : index
    %c90 = arith.constant 90 : index
    %62 = vector.load %arg12[%c0_65, %c90] : memref<8x512xf32, #tpu.memory_space<vmem>>, vector<8x420xf32>
    %63 = arith.minimumf %61, %62 : vector<8x420xf32>
    %c0_66 = arith.constant 0 : index
    %c0_67 = arith.constant 0 : index
    %64 = vector.load %arg11[%c0_66, %c0_67] : memref<8x420xf32, #tpu.memory_space<vmem>>, vector<8x420xf32>
    tpu.vector_store %arg11[%c0_66, %c0_67], %63 {strides = array<i32>} : memref<8x420xf32, #tpu.memory_space<vmem>>, vector<8x420xf32>,
    %c0_68 = arith.constant 0 : index
    %c36_69 = arith.constant 36 : index
    %65 = vector.load %arg11[%c0_68, %c36_69] : memref<8x420xf32, #tpu.memory_space<vmem>>, vector<8x384xf32>
    %c0_70 = arith.constant 0 : index
    %c18_71 = arith.constant 18 : index
    %66 = vector.load %arg11[%c0_70, %c18_71] : memref<8x420xf32, #tpu.memory_space<vmem>>, vector<8x384xf32>
    %67 = arith.minimumf %65, %66 : vector<8x384xf32>
    %c0_72 = arith.constant 0 : index
    %c0_73 = arith.constant 0 : index
    %68 = vector.load %arg11[%c0_72, %c0_73] : memref<8x420xf32, #tpu.memory_space<vmem>>, vector<8x384xf32>
    %69 = arith.minimumf %67, %68 : vector<8x384xf32>
    %c0_74 = arith.constant 0 : index
    %c0_75 = arith.constant 0 : index
    %70 = vector.load %arg6[%c0_74, %c0_75] : memref<1x384xf32, #tpu.memory_space<vmem>>, vector<1x384xf32>
    %cst_76 = arith.constant 5.000000e-01 : f32
    %71 = vector.broadcast %cst_76 : f32 to vector<1x384xf32>
    %72 = arith.cmpf ogt, %70, %71 : vector<1x384xf32>
    %73 = arith.cmpf oge, %38, %69 : vector<8x384xf32>
    %74 = vector.broadcast %72 : vector<1x384xi1> to vector<8x384xi1>
    %75 = arith.andi %74, %73 : vector<8x384xi1>
    %cst_77 = arith.constant 0.000000e+00 : f32
    %76 = vector.broadcast %cst_77 : f32 to vector<8x384xf32>
    %77 = arith.select %75, %38, %76 : vector<8x384xi1>, vector<8x384xf32>
    %c0_78 = arith.constant 0 : index
    %c0_79 = arith.constant 0 : index
    %78 = vector.load %arg13[%c0_78, %c0_79] : memref<8x512xf32, #tpu.memory_space<vmem>>, vector<8x384xf32>
    tpu.vector_store %arg13[%c0_78, %c0_79], %77 {strides = array<i32>} : memref<8x512xf32, #tpu.memory_space<vmem>>, vector<8x384xf32>,
    %c0_80 = arith.constant 0 : index
    %c0_81 = arith.constant 0 : index
    %79 = vector.load %arg13[%c0_80, %c0_81] : memref<8x512xf32, #tpu.memory_space<vmem>>, vector<8x384xf32>
    %c0_82 = arith.constant 0 : index
    %c0_83 = arith.constant 0 : index
    %80 = vector.load %arg9[%c0_82, %c0_83] : memref<72x384xf32, #tpu.memory_space<vmem>>, vector<8x384xf32>
    tpu.vector_store %arg9[%c0_82, %c0_83], %79 {strides = array<i32>} : memref<72x384xf32, #tpu.memory_space<vmem>>, vector<8x384xf32>,
    %c0_84 = arith.constant 0 : index
    %c1_85 = arith.constant 1 : index
    %81 = vector.load %arg13[%c0_84, %c1_85] : memref<8x512xf32, #tpu.memory_space<vmem>>, vector<8x384xf32>
    %c8_86 = arith.constant 8 : index
    %c0_87 = arith.constant 0 : index
    %82 = vector.load %arg9[%c8_86, %c0_87] : memref<72x384xf32, #tpu.memory_space<vmem>>, vector<8x384xf32>
    tpu.vector_store %arg9[%c8_86, %c0_87], %81 {strides = array<i32>} : memref<72x384xf32, #tpu.memory_space<vmem>>, vector<8x384xf32>,
    %c0_88 = arith.constant 0 : index
    %c2_89 = arith.constant 2 : index
    %83 = vector.load %arg13[%c0_88, %c2_89] : memref<8x512xf32, #tpu.memory_space<vmem>>, vector<8x384xf32>
    %c16_90 = arith.constant 16 : index
    %c0_91 = arith.constant 0 : index
    %84 = vector.load %arg9[%c16_90, %c0_91] : memref<72x384xf32, #tpu.memory_space<vmem>>, vector<8x384xf32>
    tpu.vector_store %arg9[%c16_90, %c0_91], %83 {strides = array<i32>} : memref<72x384xf32, #tpu.memory_space<vmem>>, vector<8x384xf32>,
    %c0_92 = arith.constant 0 : index
    %c18_93 = arith.constant 18 : index
    %85 = vector.load %arg13[%c0_92, %c18_93] : memref<8x512xf32, #tpu.memory_space<vmem>>, vector<8x384xf32>
    %c24_94 = arith.constant 24 : index
    %c0_95 = arith.constant 0 : index
    %86 = vector.load %arg9[%c24_94, %c0_95] : memref<72x384xf32, #tpu.memory_space<vmem>>, vector<8x384xf32>
    tpu.vector_store %arg9[%c24_94, %c0_95], %85 {strides = array<i32>} : memref<72x384xf32, #tpu.memory_space<vmem>>, vector<8x384xf32>,
    %c0_96 = arith.constant 0 : index
    %c19_97 = arith.constant 19 : index
    %87 = vector.load %arg13[%c0_96, %c19_97] : memref<8x512xf32, #tpu.memory_space<vmem>>, vector<8x384xf32>
    %c32_98 = arith.constant 32 : index
    %c0_99 = arith.constant 0 : index
    %88 = vector.load %arg9[%c32_98, %c0_99] : memref<72x384xf32, #tpu.memory_space<vmem>>, vector<8x384xf32>
    tpu.vector_store %arg9[%c32_98, %c0_99], %87 {strides = array<i32>} : memref<72x384xf32, #tpu.memory_space<vmem>>, vector<8x384xf32>,
    %c0_100 = arith.constant 0 : index
    %c20_101 = arith.constant 20 : index
    %89 = vector.load %arg13[%c0_100, %c20_101] : memref<8x512xf32, #tpu.memory_space<vmem>>, vector<8x384xf32>
    %c40_102 = arith.constant 40 : index
    %c0_103 = arith.constant 0 : index
    %90 = vector.load %arg9[%c40_102, %c0_103] : memref<72x384xf32, #tpu.memory_space<vmem>>, vector<8x384xf32>
    tpu.vector_store %arg9[%c40_102, %c0_103], %89 {strides = array<i32>} : memref<72x384xf32, #tpu.memory_space<vmem>>, vector<8x384xf32>,
    %c0_104 = arith.constant 0 : index
    %c36_105 = arith.constant 36 : index
    %91 = vector.load %arg13[%c0_104, %c36_105] : memref<8x512xf32, #tpu.memory_space<vmem>>, vector<8x384xf32>
    %c48_106 = arith.constant 48 : index
    %c0_107 = arith.constant 0 : index
    %92 = vector.load %arg9[%c48_106, %c0_107] : memref<72x384xf32, #tpu.memory_space<vmem>>, vector<8x384xf32>
    tpu.vector_store %arg9[%c48_106, %c0_107], %91 {strides = array<i32>} : memref<72x384xf32, #tpu.memory_space<vmem>>, vector<8x384xf32>,
    %c0_108 = arith.constant 0 : index
    %c37_109 = arith.constant 37 : index
    %93 = vector.load %arg13[%c0_108, %c37_109] : memref<8x512xf32, #tpu.memory_space<vmem>>, vector<8x384xf32>
    %c56_110 = arith.constant 56 : index
    %c0_111 = arith.constant 0 : index
    %94 = vector.load %arg9[%c56_110, %c0_111] : memref<72x384xf32, #tpu.memory_space<vmem>>, vector<8x384xf32>
    tpu.vector_store %arg9[%c56_110, %c0_111], %93 {strides = array<i32>} : memref<72x384xf32, #tpu.memory_space<vmem>>, vector<8x384xf32>,
    %c0_112 = arith.constant 0 : index
    %c38_113 = arith.constant 38 : index
    %95 = vector.load %arg13[%c0_112, %c38_113] : memref<8x512xf32, #tpu.memory_space<vmem>>, vector<8x384xf32>
    %c64_114 = arith.constant 64 : index
    %c0_115 = arith.constant 0 : index
    %96 = vector.load %arg9[%c64_114, %c0_115] : memref<72x384xf32, #tpu.memory_space<vmem>>, vector<8x384xf32>
    tpu.vector_store %arg9[%c64_114, %c0_115], %95 {strides = array<i32>} : memref<72x384xf32, #tpu.memory_space<vmem>>, vector<8x384xf32>,
    %c0_116 = arith.constant 0 : index
    %c0_117 = arith.constant 0 : index
    %97 = vector.load %arg4[%c0_116, %c0_117] : memref<8x72xf32, #tpu.memory_space<vmem>>, vector<8x72xf32>
    %c0_118 = arith.constant 0 : index
    %c0_119 = arith.constant 0 : index
    %98 = vector.load %arg9[%c0_118, %c0_119] : memref<72x384xf32, #tpu.memory_space<vmem>>, vector<72x384xf32>
    %cst_120 = arith.constant dense<0.000000e+00> : vector<8x384xf32>
    %99 = tpu.matmul %97, %98, %cst_120 {dimension_numbers = #tpu.dot_dimension_numbers<[1], [0], [0], [1], [0, 0, 1, 1], [], []>} : vector<8x72xf32>, vector<72x384xf32>, vector<8x384xf32> -> vector<8x384xf32>
    %c0_121 = arith.constant 0 : index
    %c0_122 = arith.constant 0 : index
    %100 = vector.load %arg5[%c0_121, %c0_122] : memref<8x1xf32, #tpu.memory_space<vmem>>, vector<8x1xf32>
    %101 = vector.broadcast %100 : vector<8x1xf32> to vector<8x384xf32>
    %102 = arith.addf %99, %101 : vector<8x384xf32>
    %c0_123 = arith.constant 0 : index
    %c0_124 = arith.constant 0 : index
    %c0_125 = arith.constant 0 : index
    %103 = vector.load %arg8[%c0_123, %c0_124, %c0_125] : memref<1x8x384xf32, #tpu.memory_space<vmem>>, vector<1x8x384xf32>
    %104 = vector.shape_cast %103 : vector<1x8x384xf32> to vector<8x384xf32>
    %105 = vector.shape_cast %102 : vector<8x384xf32> to vector<1x8x384xf32>
    tpu.vector_store %arg8[%c0_123, %c0_124, %c0_125], %105 {strides = array<i32>} : memref<1x8x384xf32, #tpu.memory_space<vmem>>, vector<1x8x384xf32>,
    return
  }
  func.func @transform_0(%arg0: i32) -> (i32, i32, i32) {
    %c0_i32 = arith.constant 0 : i32
    %c0_i32_0 = arith.constant 0 : i32
    %c0_i32_1 = arith.constant 0 : i32
    return %arg0, %c0_i32, %c0_i32_0 : i32, i32, i32
  }
  func.func @transform_1(%arg0: i32) -> (i32, i32) {
    %c0_i32 = arith.constant 0 : i32
    %c0_i32_0 = arith.constant 0 : i32
    %c0_i32_1 = arith.constant 0 : i32
    return %c0_i32, %c0_i32_0 : i32, i32
  }
  func.func @transform_2(%arg0: i32) -> (i32, i32) {
    %c0_i32 = arith.constant 0 : i32
    %c0_i32_0 = arith.constant 0 : i32
    %c0_i32_1 = arith.constant 0 : i32
    return %c0_i32, %c0_i32_0 : i32, i32
  }
  func.func @transform_3(%arg0: i32) -> (i32, i32) {
    %c0_i32 = arith.constant 0 : i32
    %c0_i32_0 = arith.constant 0 : i32
    %c0_i32_1 = arith.constant 0 : i32
    return %c0_i32, %c0_i32_0 : i32, i32
  }
  func.func @transform_4(%arg0: i32) -> (i32, i32) {
    %c0_i32 = arith.constant 0 : i32
    %c0_i32_0 = arith.constant 0 : i32
    %c0_i32_1 = arith.constant 0 : i32
    return %c0_i32, %c0_i32_0 : i32, i32
  }
  func.func @transform_5(%arg0: i32) -> (i32, i32) {
    %c0_i32 = arith.constant 0 : i32
    %c0_i32_0 = arith.constant 0 : i32
    %c0_i32_1 = arith.constant 0 : i32
    return %c0_i32, %c0_i32_0 : i32, i32
  }
  func.func @transform_6(%arg0: i32) -> (i32, i32) {
    %c0_i32 = arith.constant 0 : i32
    %c0_i32_0 = arith.constant 0 : i32
    %c0_i32_1 = arith.constant 0 : i32
    return %c0_i32, %c0_i32_0 : i32, i32
  }
  func.func @transform_7(%arg0: i32) -> (i32, i32, i32) {
    %c0_i32 = arith.constant 0 : i32
    %c0_i32_0 = arith.constant 0 : i32
    %c0_i32_1 = arith.constant 0 : i32
    return %arg0, %c0_i32, %c0_i32_0 : i32, i32, i32
  }
}

</mosaic_0001>

<bundles_post_ra>
// kernel: encoder_forward.1
= control target key start
LH: loop header
LB: loop body
LE: loop exit
PB: predicated region body
PF: predicated region fallthrough
CT: control target
= control target key end

     0   :  { %s1774_s24 = smov 0   ;;  %s2057_s0 = inlined_call_operand.vmem [shape: f32[2,8,512], index: 0, kind: input, shape index: {}]   ;;  %s2058_s1 = inlined_call_operand.vmem [shape: f32[8,72], index: 1, kind: input, shape index: {}]   ;;  %s2059_s2 = inlined_call_operand.vmem [shape: f32[8,1], index: 2, kind: input, shape index: {}]   ;;  %s2060_s3 = inlined_call_operand.vmem [shape: f32[8,72], index: 3, kind: input, shape index: {}]   ;;  %s2061_s4 = inlined_call_operand.vmem [shape: f32[8,1], index: 4, kind: input, shape index: {}]   ;;  %s2062_s5 = inlined_call_operand.vmem [shape: f32[1,384], index: 5, kind: input, shape index: {}]   ;;  %s2063_s6 = inlined_call_operand.vmem [shape: f32[1,384], index: 6, kind: input, shape index: {}]   ;;  %s2064_s7 = inlined_call_operand.vmem [shape: f32[2,8,384], index: 7, kind: output, shape index: {}]  }
   0x1 LB: > { %s1400_s25 = sadd.s32 4294967295, %s1714_s24   ;;  %p1404_p0 = scmp.ge.s32.totalorder %s1714_s24, 1  ;;  %s1714_s24 = sphi %s1774_s24, %s17_s24  }
   0x2   : > { %p237_p1 = scmp.lt.s32.totalorder %s1714_s24, 3 }
   0x4   : > { %p238_p2 = pnand %p1404_p0, %p237_p1 }
   0x5   : > { %p269_p3 = scmp.lt.s32.totalorder (!%p238_p2), %s1400_s25, 1  ;;  %v1716_v0 = vmov (!%p238_p2), 0.0|0.0   ;;  %s1717_s30 = smov (!%p238_p2), 126   ;;  %v1722_v7 = vmov (!%p238_p2), 0.0   ;;  %vm1725_vm0 = vmmov (!%p238_p2), 0   ;;  %v1726_v8 = vmov (!%p238_p2), 0  }
   0x6   : > { %241 = sbr.rel (%p238_p2) target bundleno = 1520 (0x5f0), region = 48  ;;  %1496 = vmatprep.subr.bf16.mxu1 (!%p238_p2), %v1716_v0  ;;  %s1718_s8 = smov (!%p238_p2), 127   ;;  %598 = vmatprep.mubr.f32.mxu0 (!%p238_p2), %v1722_v7  ;;  %v524_v9 = vld [vmem:[%s2059_s2] sm:$0xff] (!%p238_p2)  ;;  %vm304_vm1 = vcmask (!%p238_p2), 1039360   ;;  %vm330_vm2 = vcmask (!%p238_p2), 1031168   ;;  %vm356_vm3 = vcmask (!%p238_p2), 900096  }
   0x7   : > { %s1719_s9 = smov (!%p238_p2), 110   ;;  %s1720_s10 = smov (!%p238_p2), 108   ;;  %1456 = vmatprep.mubr.msk.f32.mxu1 (!%p238_p2), %vm1725_vm0, %v1722_v7  ;;  %1636 = vset.pattern.permute.xlu0 (!%p238_p2), %v1726_v8  ;;  %vm382_vm4 = vcmask (!%p238_p2), 891904   ;;  %vm408_vm5 = vcmask (!%p238_p2), 883712   ;;  %vm434_vm6 = vcmask (!%p238_p2), 752640   ;;  %vm460_vm7 = vcmask (!%p238_p2), 744448  }
   0x8   : > { %s1721_s11 = smov (!%p238_p2), 109   ;;  %s1723_s12 = smov (!%p238_p2), 91   ;;  %1707 = vset.pattern.permute.xlu1 (!%p238_p2), %v1726_v8  ;;  %vm486_vm8 = vcmask (!%p238_p2), 736256   ;;  %vm2065_vm9 = vcmask (!%p238_p2), 588800   ;;  %vm727_vm10 = vcmask (!%p238_p2), 293888   ;;  %vm811_vm15 = vcmask (!%p238_p2), 7168  }
   0x9   : > { %s1724_s13 = smov (!%p238_p2), 92   ;;  %s1727_s14 = smov (!%p238_p2), 90  }
   0xa   : > { %s1729_s19 = smov (!%p238_p2), 1   ;;  %s1730_s20 = smov (!%p238_p2), 2  }
   0xb   : > { %s1731_s23 = smov (!%p238_p2), 36  }
   0xd   : > { %s2075_s25 = smov (!%p269_p3, %s1400_s25), 1 }
   0xe   : > { %s1414_s26 = sshll.u32 %s2075_s25, 5 }
   0xf   : > { %s273_s29 = scalar_lea.vmem %s2057_s0, %s1414_s26  ;;  %s1732_s26 = smov 18  }
  0x10   : > { %v315_v1 = vld [vmem:[%s273_s29 + $0x8] sm:$0xff]  ;;  %v1789_v2 = vld [vmem:[%s273_s29 + $0x10] sm:$0xff]  ;;  %v1791_v3 = vld [vmem:[%s273_s29] sm:$0xff] }
  0x11   : > { %v1576_v4 = vpack.i.bf16 %v1789_v2, %v315_v1  ;;  %v291_v5 = vld [vmem:[%s273_s29 + $0x18] sm:$0xff] }
  0x12   : > { %v1571_v6 = vpack.i.bf16 %v291_v5, %v1791_v3 }
  0x13   : > { %1577 = vrot.lane.b32.xlu1 %v1576_v4, %s1717_s30  ;;  %1567 = vrot.lane.b32.xlu0 %v1576_v4, %s1718_s8 }
  0x17   : > { %1582 = vrot.lane.b32.xlu1 %v1576_v4, %s1719_s9  ;;  %1572 = vrot.lane.b32.xlu0 %v1571_v6, %s1718_s8 }
  0x1b   : > { %1592 = vrot.lane.b32.xlu1 %v1571_v6, %s1719_s9  ;;  %1587 = vrot.lane.b32.xlu0 %v1571_v6, %s1717_s30 }
  0x1f   : > { %1602 = vrot.lane.b32.xlu1 %v1576_v4, %s1720_s10  ;;  %1597 = vrot.lane.b32.xlu0 %v1576_v4, %s1721_s11 }
  0x23   : > { %1612 = vrot.lane.b32.xlu1 %v1571_v6, %s1720_s10  ;;  %1607 = vrot.lane.b32.xlu0 %v1571_v6, %s1721_s11 }
  0x27   : > { %1622 = vrot.lane.b32.xlu1 %v1576_v4, %s1723_s12  ;;  %1617 = vrot.lane.b32.xlu0 %v1576_v4, %s1724_s13 }
  0x2b   : > { %1632 = vrot.lane.b32.xlu1 %v1571_v6, %s1723_s12  ;;  %1627 = vrot.lane.b32.xlu0 %v1571_v6, %s1724_s13 }
  0x2f   : > { %482 = vrot.lane.b32.xlu1 %v1789_v2, %s1727_s14  ;;  %480 = vrot.lane.b32.xlu0 %v315_v1, %s1727_s14 }
  0x33   : > { %484 = vrot.lane.b32.xlu1 %v291_v5, %s1727_s14  ;;  %478 = vrot.lane.b32.xlu0 %v1791_v3, %s1727_s14 }
  0x37   : > { %527 = vperm.xlu0 %1636, %v524_v9   ;;  %692 = vrot.lane.b32.xlu1 %v1722_v7, %s1718_s8 }
  0x85   : > { %v1578_v10 = vpop.permute.xlu1 %1577  ;;  %v1568_v11 = vpop.permute.xlu0 %1567 }
  0x86   : > { %v1570_v12 = vunpack.i.h.bf16 %v1568_v11  ;;  %v1569_v13 = vunpack.i.l.bf16 %v1568_v11  ;;  %v1580_v14 = vunpack.i.h.bf16 %v1578_v10  ;;  %v1579_v15 = vunpack.i.l.bf16 %v1578_v10 }
  0x88   : > { %v306_v16 = vsel %vm304_vm1, %v1569_v13, %v1570_v12  ;;  %v332_v26 = vsel %vm330_vm2, %v1579_v15, %v1580_v14 }
  0x89   : > { %v1583_v17 = vpop.permute.xlu1 %1582  ;;  %v1573_v18 = vpop.permute.xlu0 %1572  ;;  %v1480_v19 = vpack.c.bf16 %v306_v16, %v315_v1 }
  0x8a   : > { %v1585_v20 = vunpack.i.h.bf16 %v1583_v17  ;;  %v1584_v21 = vunpack.i.l.bf16 %v1583_v17  ;;  %v1575_v22 = vunpack.i.h.bf16 %v1573_v18  ;;  %v1574_v23 = vunpack.i.l.bf16 %v1573_v18 }
  0x8b   : > { %1481 = vmatprep.subr.bf16.mxu0 %v1480_v19 }
  0x8c   : > { %v305_v24 = vsel %vm304_vm1, %v1574_v23, %v1569_v13  ;;  %v307_v25 = vsel %vm304_vm1, %v1570_v12, %v1575_v22  ;;  %v358_v27 = vsel %vm356_vm3, %v1584_v21, %v1585_v20 }
  0x8d   : > { %v1593_v28 = vpop.permute.xlu1 %1592  ;;  %v1588_v29 = vpop.permute.xlu0 %1587  ;;  %v1482_v30 = vpack.c.bf16 %v305_v24, %v1791_v3  ;;  %v1497_v31 = vpack.c.bf16 %v307_v25, %v1789_v2  ;;  %v1484_v32 = vpack.c.bf16 %v358_v27, %v332_v26 }
  0x8e   : > { %v1595_v33 = vunpack.i.h.bf16 %v1593_v28  ;;  %v1594_v34 = vunpack.i.l.bf16 %v1593_v28  ;;  %v1590_v35 = vunpack.i.h.bf16 %v1588_v29  ;;  %v1589_v36 = vunpack.i.l.bf16 %v1588_v29  ;;  %v496_v29 = vld [vmem:[%s2058_s1] sm:$0xff] }
  0x8f   : > { %1483 = vmatpush1.bf16.msra.mxu0 %v1482_v30  ;;  %1498 = vmatpush3.bf16.msra.mxu1 %v1497_v31 }
  0x90   : > { %1485 = vmatprep.subr.bf16.mxu0 %v1484_v32  ;;  %1499 = vmatprep.subr.bf16.mxu1 %v1716_v0  ;;  %v331_v37 = vsel %vm330_vm2, %v1589_v36, %v1579_v15  ;;  %v357_v38 = vsel %vm356_vm3, %v1594_v34, %v1584_v21  ;;  %v333_v39 = vsel %vm330_vm2, %v1580_v14, %v1590_v35 }
  0x91   : > { %v1603_v40 = vpop.permute.xlu1 %1602  ;;  %v1598_v41 = vpop.permute.xlu0 %1597  ;;  %v1486_v42 = vpack.c.bf16 %v357_v38, %v331_v37  ;;  %v359_v43 = vsel %vm356_vm3, %v1585_v20, %v1595_v33 }
  0x92   : > { %v1605_v44 = vunpack.i.h.bf16 %v1603_v40  ;;  %v1604_v45 = vunpack.i.l.bf16 %v1603_v40  ;;  %v1600_v46 = vunpack.i.h.bf16 %v1598_v41  ;;  %v1599_v47 = vunpack.i.l.bf16 %v1598_v41 }
  0x93   : > { %1487 = vmatpush1.bf16.msra.mxu0 %v1486_v42  ;;  %v1500_v48 = vpack.c.bf16 %v359_v43, %v333_v39 }
  0x94   : > { %v384_v49 = vsel %vm382_vm4, %v1599_v47, %v1600_v46  ;;  %v410_v50 = vsel %vm408_vm5, %v1604_v45, %v1605_v44 }
  0x95   : > { %1501 = vmatpush3.bf16.msra.mxu1 %v1500_v48  ;;  %v1613_v51 = vpop.permute.xlu1 %1612  ;;  %v1608_v52 = vpop.permute.xlu0 %1607  ;;  %v1488_v53 = vpack.c.bf16 %v410_v50, %v384_v49 }
  0x96   : > { %v1615_v54 = vunpack.i.h.bf16 %v1613_v51  ;;  %v1614_v55 = vunpack.i.l.bf16 %v1613_v51  ;;  %v1610_v56 = vunpack.i.h.bf16 %v1608_v52  ;;  %v1609_v57 = vunpack.i.l.bf16 %v1608_v52  ;;  %1502 = vmatprep.subr.bf16.mxu1 %v1716_v0 }
  0x97   : > { %1489 = vmatprep.subr.bf16.mxu0 %v1488_v53 }
  0x98   : > { %v383_v58 = vsel %vm382_vm4, %v1609_v57, %v1599_v47  ;;  %v409_v59 = vsel %vm408_vm5, %v1614_v55, %v1604_v45  ;;  %v385_v60 = vsel %vm382_vm4, %v1600_v46, %v1610_v56  ;;  %v411_v61 = vsel %vm408_vm5, %v1605_v44, %v1615_v54 }
  0x99   : > { %v1623_v62 = vpop.permute.xlu1 %1622  ;;  %v1618_v63 = vpop.permute.xlu0 %1617  ;;  %v1490_v1 = vpack.c.bf16 %v409_v59, %v383_v58  ;;  %v1503_v2 = vpack.c.bf16 %v411_v61, %v385_v60 }
  0x9a   : > { %v1625_v3 = vunpack.i.h.bf16 %v1623_v62  ;;  %v1624_v4 = vunpack.i.l.bf16 %v1623_v62  ;;  %v1620_v5 = vunpack.i.h.bf16 %v1618_v63  ;;  %v1619_v6 = vunpack.i.l.bf16 %v1618_v63 }
  0x9b   : > { %1491 = vmatpush1.bf16.msra.mxu0 %v1490_v1  ;;  %1504 = vmatpush3.bf16.msra.mxu1 %v1503_v2  ;;  %v1728_v63 = vmov inf   ;;  %v774_v2 = vlaneseq }
  0x9c   : > { %v436_v9 = vsel %vm434_vm6, %v1619_v6, %v1620_v5  ;;  %v462_v10 = vsel %vm460_vm7, %v1624_v4, %v1625_v3  ;;  %1505 = vmatprep.subr.bf16.mxu1 %v1716_v0 }
  0x9d   : > { %v1633_v11 = vpop.permute.xlu1 %1632  ;;  %v1628_v12 = vpop.permute.xlu0 %1627  ;;  %v1492_v13 = vpack.c.bf16 %v462_v10, %v436_v9 }
  0x9e   : > { %v1635_v14 = vunpack.i.h.bf16 %v1633_v11  ;;  %v1634_v15 = vunpack.i.l.bf16 %v1633_v11  ;;  %v1630_v16 = vunpack.i.h.bf16 %v1628_v12  ;;  %v1629_v17 = vunpack.i.l.bf16 %v1628_v12 }
  0x9f   : > { %1493 = vmatprep.subr.bf16.mxu0 %v1492_v13 }
  0xa0   : > { %v435_v18 = vsel %vm434_vm6, %v1629_v17, %v1619_v6  ;;  %v461_v19 = vsel %vm460_vm7, %v1634_v15, %v1624_v4  ;;  %v437_v20 = vsel %vm434_vm6, %v1620_v5, %v1630_v16  ;;  %v463_v21 = vsel %vm460_vm7, %v1625_v3, %v1635_v14  ;;  %v771_v3 = vld [vmem:[%s2063_s6] sm:$0x7] }
  0xa1   : > { %v483_v22 = vpop.permute.xlu1 %482  ;;  %v481_v23 = vpop.permute.xlu0 %480  ;;  %v1494_v24 = vpack.c.bf16 %v461_v19, %v435_v18  ;;  %v1506_v25 = vpack.c.bf16 %v463_v21, %v437_v20  ;;  %v1907_v5 = vshrl.u32 %v774_v2, 7  ;;  %vm772_vm11 = vcmp.gt.f32.partialorder %v771_v3, 0.5 }
  0xa2   : > { %v488_v26 = vsel %vm486_vm8, %v481_v23, %v483_v22  ;;  %v773_v11 = vsel %vm772_vm11, 1, %v1726_v8  ;;  %vm882_vm11 = vcmask 146432  }
  0xa3   : > { %1495 = vmatpush1.bf16.msra.mxu0 %v1494_v24  ;;  %1507 = vmatpush3.bf16.msra.mxu1 %v1506_v25  ;;  %v780_v10 = vsub.s32 1, %v1907_v5  ;;  %v784_v14 = vsub.s32 2, %v1907_v5  ;;  %v776_v19 = vsub.s32 0, %v1907_v5 }
  0xa4   : > { %550 = vmatprep.subr.mxu0 %v488_v26  ;;  %1454 = vmatprep.subr.mxu1 %v1722_v7 }
  0xa5   : > { %v485_v27 = vpop.permute.xlu1 %484  ;;  %v479_v28 = vpop.permute.xlu0 %478  ;;  %v781_v15 = vrot.slane %v773_v11, %v780_v10 }
  0xa6   : > { %v487_v30 = vsel %vm486_vm8, %v479_v28, %v481_v23  ;;  %v489_v31 = vsel %vm486_vm8, %v483_v22, %v485_v27  ;;  %v785_v22 = vrot.slane %v773_v11, %v784_v14 }
  0xa7   : > { %551 = vmatpush1.msra.mxu0 %v487_v30  ;;  %1455 = vmatpush3.msra.mxu1 %v489_v31  ;;  %vm787_vm12 = vcmp.eq.s32.totalorder %v781_v15, 1  ;;  %v777_v31 = vrot.slane %v773_v11, %v776_v19 }
  0xa8   : > { %1408 = vmatmul.mubr.msk.f32.vlgmr.msra.gmra.mrb[0].mxu0 %vm2065_vm9, %v496_v29  ;;  %1457 = vmatmul.mubr.msk.f32.vlgmr.msra.gmra.mrb[0].mxu1 %vm2065_vm9, %v496_v29  ;;  %vm788_vm13 = vcmp.eq.s32.totalorder %v785_v22, 1 }
  0xa9   : > { %1526 = vmatprep.subr.bf16.mxu1 %v1716_v0  ;;  %1265 = vmatprep.mubr.f32.mxu0 %v1722_v7  ;;  %v693_v40 = vpop.permute.xlu1 %692  ;;  %vm786_vm14 = vcmp.eq.s32.totalorder %v777_v31, 1  ;;  %v910_v31 = vld [vmem:[%s2062_s5] sm:$0x7] }
  0xaa   : > { %1477 = vmatprep.mubr.msk.f32.mxu1 %vm1725_vm0, %v1722_v7  ;;  %v704_v47 = vmax.f32 %v693_v40, 0.0  ;;  %vm831_vm0 = vcmask 15360  }
  0xb6   : > { %v528_v32 = vpop.permute.xlu0 %527 }
 0x17b   : > { %v600_v33 = vpop.f32.mrb[0].mxu0  ;;  %v671_v34 = vpop.f32.mrb[0].mxu1 }
 0x17c   : > { %v1864_v35 = vadd.f32 %v600_v33, %v528_v32  ;;  %v1866_v36 = vadd.f32 %v671_v34, %v528_v32  ;;  %v602_v37 = vpop.f32.mrb[1].mxu0  ;;  %v1458_v38 = vpop.f32.mrb[1].mxu1 }
 0x17d   : > { %v1872_v39 = vadd.f32 %v602_v37, %v528_v32 }
 0x17e   : > { %690 = vrot.lane.b32.xlu0 %v1866_v36, %s1718_s8  ;;  %686 = vrot.lane.b32.xlu1 %v1864_v35, %s1718_s8 }
 0x182   : > { %705 = vrot.lane.b32.xlu0 %v1864_v35, %s1717_s30  ;;  %688 = vrot.lane.b32.xlu1 %v1872_v39, %s1718_s8 }
 0x186   : > { %709 = vrot.lane.b32.xlu0 %v1866_v36, %s1717_s30  ;;  %707 = vrot.lane.b32.xlu1 %v1872_v39, %s1717_s30 }
 0x18a   : > { %711 = vrot.lane.b32.xlu1 %v1722_v7, %s1717_s30 }
 0x1f0   : > { %v691_v41 = vpop.permute.xlu0 %690  ;;  %v687_v42 = vpop.permute.xlu1 %686 }
 0x1f1   : > { %v696_v46 = vsel %vm304_vm1, %v691_v41, %v693_v40 }
 0x1f2   : > { %v703_v48 = vmax.f32 %v1866_v36, %v696_v46 }
 0x1f4   : > { %v689_v43 = vpop.permute.xlu1 %688  ;;  %v706_v44 = vpop.permute.xlu0 %705 }
 0x1f5   : > { %v694_v51 = vsel %vm304_vm1, %v687_v42, %v689_v43  ;;  %v695_v58 = vsel %vm304_vm1, %v689_v43, %v691_v41 }
 0x1f6   : > { %v701_v56 = vmax.f32 %v1864_v35, %v694_v51  ;;  %v702_v61 = vmax.f32 %v1872_v39, %v695_v58 }
 0x1f8   : > { %v708_v45 = vpop.permute.xlu1 %707  ;;  %v710_v49 = vpop.permute.xlu0 %709 }
 0x1f9   : > { %v713_v55 = vsel %vm330_vm2, %v706_v44, %v708_v45  ;;  %v714_v59 = vsel %vm330_vm2, %v708_v45, %v710_v49 }
 0x1fa   : > { %v720_v57 = vmax.f32 %v701_v56, %v713_v55  ;;  %v721_v62 = vmax.f32 %v702_v61, %v714_v59 }
 0x1fc   : > { %v712_v50 = vpop.permute.xlu1 %711 }
 0x1fd   : > { %v715_v52 = vsel %vm330_vm2, %v710_v49, %v712_v50  ;;  %v723_v53 = vmax.f32 %v704_v47, %v712_v50 }
 0x1fe   : > { %v722_v54 = vmax.f32 %v703_v48, %v715_v52 }
 0x1ff   : > { %728 = vst.msk [vmem:[#allocation4 + $0x18] sm:$0xff] %vm727_vm10, %v723_v53 }
 0x200   : > { %741 = vrot.lane.b32.xlu0 %v722_v54, %s1719_s9 }
 0x204   : > { %737 = vrot.lane.b32.xlu0 %v720_v57, %s1719_s9 }
 0x206   : > { %v732_v60 = vld [vmem:[#allocation4 + $0x18] sm:$0xff] }
 0x207   : > { %743 = vrot.lane.b32.xlu1 %v732_v60, %s1719_s9 }
 0x208   : > { %754 = vrot.lane.b32.xlu0 %v720_v57, %s1724_s13 }
 0x20b   : > { %739 = vrot.lane.b32.xlu1 %v721_v62, %s1719_s9 }
 0x20c   : > { %758 = vrot.lane.b32.xlu0 %v722_v54, %s1724_s13 }
 0x20f   : > { %756 = vrot.lane.b32.xlu1 %v721_v62, %s1724_s13 }
 0x210   : > { %803 = vrot.lane.b32.xlu0 %v1728_v63, %s1729_s19 }
 0x213   : > { %760 = vrot.lane.b32.xlu1 %v732_v60, %s1724_s13 }
 0x214   : > { %823 = vrot.lane.b32.xlu0 %v1728_v63, %s1730_s20 }
 0x272   : > { %v742_v1 = vpop.permute.xlu0 %741 }
 0x276   : > { %v738_v4 = vpop.permute.xlu0 %737 }
 0x279   : > { %v744_v6 = vpop.permute.xlu1 %743 }
 0x27a   : > { %v755_v9 = vpop.permute.xlu0 %754  ;;  %v747_v20 = vsel %vm356_vm3, %v742_v1, %v744_v6 }
 0x27b   : > { %v753_v26 = vmax.f32 %v722_v54, %v747_v20 }
 0x27d   : > { %v740_v12 = vpop.permute.xlu1 %739 }
 0x27e   : > { %v746_v13 = vsel %vm356_vm3, %v740_v12, %v742_v1  ;;  %v759_v16 = vpop.permute.xlu0 %758  ;;  %v745_v25 = vsel %vm356_vm3, %v738_v4, %v740_v12 }
 0x27f   : > { %v752_v17 = vmax.f32 %v721_v62, %v746_v13  ;;  %v751_v32 = vmax.f32 %v720_v57, %v745_v25 }
 0x281   : > { %v757_v18 = vpop.permute.xlu1 %756 }
 0x282   : > { %v763_v21 = vsel %vm434_vm6, %v757_v18, %v759_v16  ;;  %v804_v24 = vpop.permute.xlu0 %803  ;;  %v762_v29 = vsel %vm434_vm6, %v755_v9, %v757_v18 }
 0x283   : > { %v769_v23 = vmax.f32 %v752_v17, %v763_v21  ;;  %v768_v34 = vmax.f32 %v751_v32, %v762_v29 }
 0x285   : > { %v761_v27 = vpop.permute.xlu1 %760  ;;  %v790_v28 = vsel %vm787_vm12, %v769_v23, inf  ;;  %v789_v41 = vsel %vm786_vm14, %v768_v34, inf  ;;  %vm911_vm12 = vcmp.gt.f32.partialorder %v910_v31, 0.5 }
 0x286   : > { %v764_v30 = vsel %vm434_vm6, %v759_v16, %v761_v27  ;;  %807 = vrot.lane.b32.xlu0 %v790_v28, %s1729_s19  ;;  %v824_v38 = vpop.permute.xlu0 %823  ;;  %v933_v32 = vsel %vm911_vm12, 1, %v1726_v8 }
 0x287   : > { %v770_v33 = vmax.f32 %v753_v26, %v764_v30  ;;  %v839_v40 = vmin.f32 %v804_v24, %v824_v38 }
 0x289   : > { %v791_v37 = vsel %vm788_vm13, %v770_v33, inf  ;;  %v941_v33 = vrot.slane %v933_v32, %v780_v10 }
 0x28a   : > { %809 = vrot.lane.b32.xlu1 %v791_v37, %s1729_s19  ;;  %827 = vrot.lane.b32.xlu0 %v790_v28, %s1730_s20 }
 0x28e   : > { %805 = vrot.lane.b32.xlu1 %v789_v41, %s1729_s19  ;;  %847 = vrot.lane.b32.xlu0 %v839_v40, %s1731_s23 }
 0x292   : > { %825 = vrot.lane.b32.xlu1 %v789_v41, %s1730_s20 }
 0x296   : > { %829 = vrot.lane.b32.xlu1 %v791_v37, %s1730_s20 }
 0x2f8   : > { %v808_v43 = vpop.permute.xlu0 %807 }
 0x2fc   : > { %v810_v42 = vpop.permute.xlu1 %809  ;;  %v828_v49 = vpop.permute.xlu0 %827 }
 0x2fd   : > { %v814_v51 = vsel %vm811_vm15, %v808_v43, %v810_v42 }
 0x2fe   : > { %v822_v56 = vmin.f32 %v791_v37, %v814_v51 }
 0x300   : > { %v806_v44 = vpop.permute.xlu1 %805  ;;  %v848_v60 = vpop.permute.xlu0 %847 }
 0x301   : > { %v812_v45 = vsel %vm811_vm15, %v804_v24, %v806_v44  ;;  %v813_v46 = vsel %vm811_vm15, %v806_v44, %v808_v43 }
 0x302   : > { %v820_v47 = vmin.f32 %v789_v41, %v812_v45  ;;  %v821_v48 = vmin.f32 %v790_v28, %v813_v46  ;;  %v937_v41 = vrot.slane %v933_v32, %v776_v19 }
 0x304   : > { %v826_v50 = vpop.permute.xlu1 %825 }
 0x305   : > { %v832_v52 = vsel %vm831_vm0, %v824_v38, %v826_v50  ;;  %v833_v53 = vsel %vm831_vm0, %v826_v50, %v828_v49  ;;  %v945_v38 = vrot.slane %v933_v32, %v784_v14 }
 0x306   : > { %v840_v54 = vmin.f32 %v820_v47, %v832_v52  ;;  %v841_v55 = vmin.f32 %v821_v48, %v833_v53 }
 0x307   : > { %vm948_vm14 = vcmp.eq.s32.totalorder %v945_v38, 1 }
 0x308   : > { %v830_v57 = vpop.permute.xlu1 %829  ;;  %849 = vrot.lane.b32.xlu1 %v840_v54, %s1731_s23  ;;  %851 = vrot.lane.b32.xlu0 %v841_v55, %s1731_s23 }
 0x309   : > { %v834_v58 = vsel %vm831_vm0, %v828_v49, %v830_v57  ;;  %v1192_v49 = vld [vmem:[%s2061_s4] sm:$0xff] }
 0x30a   : > { %v842_v59 = vmin.f32 %v822_v56, %v834_v58 }
 0x30c   : > { %853 = vrot.lane.b32.xlu1 %v842_v59, %s1731_s23 }
 0x37a   : > { %v850_v61 = vpop.permute.xlu1 %849  ;;  %v852_v62 = vpop.permute.xlu0 %851 }
 0x37b   : > { %v855_v63 = vsel %vm727_vm10, %v848_v60, %v850_v61  ;;  %v856_v1 = vsel %vm727_vm10, %v850_v61, %v852_v62 }
 0x37c   : > { %874 = vrot.lane.b32.xlu0 %v855_v63, %s1732_s26 }
 0x37e   : > { %v854_v2 = vpop.permute.xlu1 %853 }
 0x37f   : > { %v857_v3 = vsel %vm727_vm10, %v852_v62, %v854_v2  ;;  %865 = vst.msk [vmem:[#allocation4 + $0x18] sm:$0xff] %vm727_vm10, %v854_v2 }
 0x380   : > { %878 = vrot.lane.b32.xlu0 %v857_v3, %s1732_s26 }
 0x384   : > { %894 = vrot.lane.b32.xlu0 %v855_v63, %s1731_s23 }
 0x386   : > { %v869_v4 = vld [vmem:[#allocation4 + $0x18] sm:$0xff] }
 0x387   : > { %880 = vrot.lane.b32.xlu1 %v869_v4, %s1732_s26 }
 0x388   : > { %898 = vrot.lane.b32.xlu0 %v857_v3, %s1731_s23 }
 0x38b   : > { %876 = vrot.lane.b32.xlu1 %v856_v1, %s1732_s26 }
 0x38f   : > { %896 = vrot.lane.b32.xlu1 %v856_v1, %s1731_s23 }
 0x3ee   : > { %v875_v6 = vpop.permute.xlu0 %874 }
 0x3ef   : > { %v890_v28 = vmin.f32 %v855_v63, %v875_v6 }
 0x3f2   : > { %v879_v9 = vpop.permute.xlu0 %878 }
 0x3f6   : > { %v895_v12 = vpop.permute.xlu0 %894 }
 0x3f7   : > { %v906_v29 = vmin.f32 %v890_v28, %v895_v12 }
 0x3f9   : > { %v881_v11 = vpop.permute.xlu1 %880 }
 0x3fa   : > { %v885_v17 = vsel %vm882_vm11, %v879_v9, %v881_v11  ;;  %v899_v22 = vpop.permute.xlu0 %898 }
 0x3fb   : > { %v893_v25 = vmin.f32 %v869_v4, %v885_v17 }
 0x3fd   : > { %v877_v13 = vpop.permute.xlu1 %876  ;;  %v909_v30 = vmin.f32 %v893_v25, %v899_v22 }
 0x3fe   : > { %v883_v15 = vsel %vm882_vm11, %v875_v6, %v877_v13  ;;  %v884_v16 = vsel %vm882_vm11, %v877_v13, %v879_v9  ;;  %vm946_vm11 = vcmp.eq.s32.totalorder %v937_v41, 1 }
 0x3ff   : > { %v891_v18 = vmin.f32 %v856_v1, %v883_v15  ;;  %v892_v20 = vmin.f32 %v857_v3, %v884_v16 }
 0x401   : > { %v897_v21 = vpop.permute.xlu1 %896 }
 0x402   : > { %v900_v23 = vsel %vm727_vm10, %v895_v12, %v897_v21  ;;  %v901_v24 = vsel %vm727_vm10, %v897_v21, %v899_v22  ;;  %vm947_vm10 = vcmp.eq.s32.totalorder %v941_v33, 1 }
 0x403   : > { %v907_v26 = vmin.f32 %v891_v18, %v900_v23  ;;  %v908_v27 = vmin.f32 %v892_v20, %v901_v24 }
 0x405   : > { %918 = vrot.lane.b32.xlu1 %v907_v26, %s1724_s13  ;;  %920 = vrot.lane.b32.xlu0 %v908_v27, %s1724_s13 }
 0x409   : > { %922 = vrot.lane.b32.xlu1 %v909_v30, %s1724_s13  ;;  %916 = vrot.lane.b32.xlu0 %v906_v29, %s1724_s13 }
 0x477   : > { %v919_v34 = vpop.permute.xlu1 %918  ;;  %v921_v37 = vpop.permute.xlu0 %920 }
 0x478   : > { %v925_v40 = vsel %vm434_vm6, %v919_v34, %v921_v37 }
 0x479   : > { %vm931_vm13 = vcmp.ge.f32.partialorder %v1872_v39, %v925_v40 }
 0x47a   : > { %vm1960_vm15 = vmand %vm947_vm10, %vm931_vm13  ;;  %vm1733_vm13 = vmmov 1  }
 0x47b   : > { %v923_v42 = vpop.permute.xlu1 %922  ;;  %v917_v43 = vpop.permute.xlu0 %916  ;;  %v953_v5 = vsel %vm1960_vm15, %v1872_v39, 0.0 }
 0x47c   : > { %v926_v10 = vsel %vm434_vm6, %v921_v37, %v923_v42  ;;  %v924_v44 = vsel %vm434_vm6, %v917_v43, %v919_v34 }
 0x47d   : > { %vm932_vm0 = vcmp.ge.f32.partialorder %v1866_v36, %v926_v10  ;;  %vm930_vm12 = vcmp.ge.f32.partialorder %v1864_v35, %v924_v44 }
 0x47e   : > { %vm1968_vm9 = vmand %vm948_vm14, %vm932_vm0 }
 0x47f   : > { %v954_v19 = vsel %vm1968_vm9, %v1866_v36, 0.0  ;;  %vm1978_vm10 = vmand %vm946_vm11, %vm930_vm12 }
 0x480   : > { %v1637_v46 = vpack.i.bf16 %v954_v19, %v953_v5  ;;  %v952_v47 = vsel %vm1978_vm10, %v1864_v35, 0.0  ;;  %vm1509_vm14 = vmpackc.low %vm1733_vm13, %vm1960_vm15 }
 0x481   : > { %v1642_v48 = vpack.i.bf16 %v1722_v7, %v952_v47  ;;  %vm1528_vm0 = vmpackc.low %vm1733_vm13, %vm1968_vm9 }
 0x482   : > { %1638 = vrot.lane.b32.xlu1 %v1637_v46, %s1718_s8  ;;  %vm1512_vm11 = vmpackc.low %vm1733_vm13, %vm1978_vm10 }
 0x483   : > { %1643 = vrot.lane.b32.xlu0 %v1642_v48, %s1718_s8 }
 0x486   : > { %1648 = vrot.lane.b32.xlu1 %v1637_v46, %s1717_s30 }
 0x487   : > { %1653 = vrot.lane.b32.xlu0 %v1637_v46, %s1719_s9 }
 0x48a   : > { %1658 = vrot.lane.b32.xlu1 %v1642_v48, %s1717_s30 }
 0x48b   : > { %1663 = vrot.lane.b32.xlu0 %v1642_v48, %s1719_s9 }
 0x48e   : > { %1668 = vrot.lane.b32.xlu1 %v1637_v46, %s1721_s11 }
 0x48f   : > { %1673 = vrot.lane.b32.xlu0 %v1637_v46, %s1720_s10 }
 0x492   : > { %1678 = vrot.lane.b32.xlu1 %v1642_v48, %s1721_s11 }
 0x493   : > { %1683 = vrot.lane.b32.xlu0 %v1642_v48, %s1720_s10  ;;  %s1539_s10 = smul.u32 24, %s2075_s25 }
 0x496   : > { %1688 = vrot.lane.b32.xlu1 %v1637_v46, %s1724_s13 }
 0x497   : > { %1693 = vrot.lane.b32.xlu0 %v1637_v46, %s1723_s12 }
 0x49a   : > { %1698 = vrot.lane.b32.xlu1 %v1642_v48, %s1724_s13  ;;  %s278_s13 = scalar_lea.vmem %s2064_s7, %s1539_s10 }
 0x49b   : > { %1703 = vrot.lane.b32.xlu0 %v1642_v48, %s1723_s12 }
 0x49e   : > { %1149 = vrot.lane.b32.xlu1 %v953_v5, %s1727_s14 }
 0x49f   : > { %1151 = vrot.lane.b32.xlu0 %v954_v19, %s1727_s14 }
 0x4a2   : > { %1147 = vrot.lane.b32.xlu1 %v952_v47, %s1727_s14 }
 0x4a3   : > { %1153 = vrot.lane.b32.xlu0 %v1722_v7, %s1727_s14 }
 0x4a6   : > { %1195 = vperm.xlu1 %1707, %v1192_v49  }
 0x4f4   : > { %v1639_v50 = vpop.permute.xlu1 %1638 }
 0x4f5   : > { %v1641_v51 = vunpack.i.h.bf16 %v1639_v50  ;;  %v1640_v52 = vunpack.i.l.bf16 %v1639_v50  ;;  %v1644_v53 = vpop.permute.xlu0 %1643 }
 0x4f6   : > { %v1646_v55 = vunpack.i.h.bf16 %v1644_v53  ;;  %v1645_v56 = vunpack.i.l.bf16 %v1644_v53 }
 0x4f7   : > { %v981_v54 = vsel %vm304_vm1, %v1640_v52, %v1641_v51 }
 0x4f8   : > { %v1508_v57 = vpack.c.bf16 %v981_v54, %v1872_v39  ;;  %v1649_v58 = vpop.permute.xlu1 %1648  ;;  %v982_v59 = vsel %vm304_vm1, %v1641_v51, %v1646_v55  ;;  %v980_v60 = vsel %vm304_vm1, %v1645_v56, %v1640_v52  ;;  %vm2072_vm1 = vcmask 588800  }
 0x4f9   : > { %v1651_v61 = vunpack.i.h.bf16 %v1649_v58  ;;  %v1650_v62 = vunpack.i.l.bf16 %v1649_v58  ;;  %v1527_v63 = vpack.c.bf16 %v982_v59, %v1866_v36  ;;  %v1511_v1 = vpack.c.bf16 %v980_v60, %v1864_v35  ;;  %v1654_v2 = vpop.permute.xlu0 %1653 }
 0x4fa   : > { %1510 = vmatprep.subr.msk.bf16.mxu0 %vm1509_vm14, %v1508_v57  ;;  %v1656_v39 = vunpack.i.h.bf16 %v1654_v2  ;;  %v1655_v3 = vunpack.i.l.bf16 %v1654_v2 }
 0x4fb   : > { %v1006_v4 = vsel %vm330_vm2, %v1650_v62, %v1651_v61  ;;  %1513 = vmatpush1.bf16.msk.msra.mxu0 %vm1512_vm11, %v1511_v1  ;;  %1529 = vmatpush3.bf16.msk.msra.mxu1 %vm1528_vm0, %v1527_v63 }
 0x4fc   : > { %v1659_v6 = vpop.permute.xlu1 %1658  ;;  %v1031_v12 = vsel %vm356_vm3, %v1655_v3, %v1656_v39  ;;  %1530 = vmatprep.subr.bf16.mxu1 %v1716_v0 }
 0x4fd   : > { %v1661_v9 = vunpack.i.h.bf16 %v1659_v6  ;;  %v1660_v11 = vunpack.i.l.bf16 %v1659_v6  ;;  %v1664_v36 = vpop.permute.xlu0 %1663  ;;  %v1514_v35 = vpack.c.bf16 %v1031_v12, %v1006_v4  ;;  %v1164_v4 = vld [vmem:[%s2060_s3] sm:$0xff] }
 0x4fe   : > { %v1666_v16 = vunpack.i.h.bf16 %v1664_v36  ;;  %v1665_v17 = vunpack.i.l.bf16 %v1664_v36 }
 0x4ff   : > { %v1007_v13 = vsel %vm330_vm2, %v1651_v61, %v1661_v9  ;;  %v1005_v15 = vsel %vm330_vm2, %v1660_v11, %v1650_v62  ;;  %1515 = vmatprep.subr.bf16.mxu0 %v1514_v35  ;;  %vm2073_vm2 = vmmov %vm2072_vm1 }
 0x500   : > { %v1669_v18 = vpop.permute.xlu1 %1668  ;;  %v1030_v20 = vsel %vm356_vm3, %v1665_v17, %v1655_v3  ;;  %v1032_v21 = vsel %vm356_vm3, %v1656_v39, %v1666_v16 }
 0x501   : > { %v1671_v22 = vunpack.i.h.bf16 %v1669_v18  ;;  %v1670_v23 = vunpack.i.l.bf16 %v1669_v18  ;;  %v1516_v24 = vpack.c.bf16 %v1030_v20, %v1005_v15  ;;  %v1531_v25 = vpack.c.bf16 %v1032_v21, %v1007_v13  ;;  %v1674_v26 = vpop.permute.xlu0 %1673 }
 0x502   : > { %v1676_v27 = vunpack.i.h.bf16 %v1674_v26  ;;  %v1675_v28 = vunpack.i.l.bf16 %v1674_v26 }
 0x503   : > { %v1056_v29 = vsel %vm382_vm4, %v1670_v23, %v1671_v22  ;;  %1517 = vmatpush1.bf16.msra.mxu0 %v1516_v24  ;;  %1532 = vmatpush3.bf16.msra.mxu1 %v1531_v25 }
 0x504   : > { %v1679_v30 = vpop.permute.xlu1 %1678  ;;  %v1081_v33 = vsel %vm408_vm5, %v1675_v28, %v1676_v27  ;;  %1533 = vmatprep.subr.bf16.mxu1 %v1716_v0 }
 0x505   : > { %v1681_v31 = vunpack.i.h.bf16 %v1679_v30  ;;  %v1680_v32 = vunpack.i.l.bf16 %v1679_v30  ;;  %v1684_v34 = vpop.permute.xlu0 %1683  ;;  %v1518_v37 = vpack.c.bf16 %v1081_v33, %v1056_v29 }
 0x506   : > { %v1686_v41 = vunpack.i.h.bf16 %v1684_v34  ;;  %v1685_v42 = vunpack.i.l.bf16 %v1684_v34 }
 0x507   : > { %v1055_v38 = vsel %vm382_vm4, %v1680_v32, %v1670_v23  ;;  %v1057_v40 = vsel %vm382_vm4, %v1671_v22, %v1681_v31  ;;  %1519 = vmatprep.subr.bf16.mxu0 %v1518_v37 }
 0x508   : > { %v1689_v43 = vpop.permute.xlu1 %1688  ;;  %v1080_v8 = vsel %vm408_vm5, %v1685_v42, %v1675_v28  ;;  %v1082_v10 = vsel %vm408_vm5, %v1676_v27, %v1686_v41 }
 0x509   : > { %v1691_v44 = vunpack.i.h.bf16 %v1689_v43  ;;  %v1690_v14 = vunpack.i.l.bf16 %v1689_v43  ;;  %v1520_v5 = vpack.c.bf16 %v1080_v8, %v1055_v38  ;;  %v1534_v19 = vpack.c.bf16 %v1082_v10, %v1057_v40  ;;  %v1694_v45 = vpop.permute.xlu0 %1693 }
 0x50a   : > { %v1696_v46 = vunpack.i.h.bf16 %v1694_v45  ;;  %v1695_v47 = vunpack.i.l.bf16 %v1694_v45 }
 0x50b   : > { %v1106_v48 = vsel %vm434_vm6, %v1690_v14, %v1691_v44  ;;  %1521 = vmatpush1.bf16.msra.mxu0 %v1520_v5  ;;  %1535 = vmatpush3.bf16.msra.mxu1 %v1534_v19 }
 0x50c   : > { %v1699_v49 = vpop.permute.xlu1 %1698  ;;  %v1131_v52 = vsel %vm460_vm7, %v1695_v47, %v1696_v46  ;;  %1536 = vmatprep.subr.bf16.mxu1 %v1716_v0 }
 0x50d   : > { %v1701_v50 = vunpack.i.h.bf16 %v1699_v49  ;;  %v1700_v51 = vunpack.i.l.bf16 %v1699_v49  ;;  %v1704_v53 = vpop.permute.xlu0 %1703  ;;  %v1522_v54 = vpack.c.bf16 %v1131_v52, %v1106_v48 }
 0x50e   : > { %v1706_v57 = vunpack.i.h.bf16 %v1704_v53  ;;  %v1705_v58 = vunpack.i.l.bf16 %v1704_v53 }
 0x50f   : > { %v1105_v55 = vsel %vm434_vm6, %v1700_v51, %v1690_v14  ;;  %v1107_v56 = vsel %vm434_vm6, %v1691_v44, %v1701_v50  ;;  %1523 = vmatprep.subr.bf16.mxu0 %v1522_v54 }
 0x510   : > { %v1150_v59 = vpop.permute.xlu1 %1149  ;;  %v1130_v60 = vsel %vm460_vm7, %v1705_v58, %v1695_v47  ;;  %v1132_v61 = vsel %vm460_vm7, %v1696_v46, %v1706_v57 }
 0x511   : > { %v1524_v62 = vpack.c.bf16 %v1130_v60, %v1105_v55  ;;  %v1537_v63 = vpack.c.bf16 %v1132_v61, %v1107_v56  ;;  %v1152_v1 = vpop.permute.xlu0 %1151 }
 0x512   : > { %v1156_v0 = vsel %vm486_vm8, %v1150_v59, %v1152_v1 }
 0x513   : > { %1525 = vmatpush1.bf16.msra.mxu0 %v1524_v62  ;;  %1538 = vmatpush3.bf16.msra.mxu1 %v1537_v63 }
 0x514   : > { %v1148_v2 = vpop.permute.xlu1 %1147  ;;  %1217 = vmatprep.subr.mxu0 %v1156_v0  ;;  %1475 = vmatprep.subr.mxu1 %v1722_v7 }
 0x515   : > { %v1155_v39 = vsel %vm486_vm8, %v1148_v2, %v1150_v59  ;;  %v1154_v3 = vpop.permute.xlu0 %1153 }
 0x516   : > { %v1157_v6 = vsel %vm486_vm8, %v1152_v1, %v1154_v3 }
 0x517   : > { %1218 = vmatpush1.msra.mxu0 %v1155_v39  ;;  %1476 = vmatpush3.msra.mxu1 %v1157_v6 }
 0x518   : > { %1410 = vmatmul.mubr.msk.f32.vlgmr.msra.gmra.mrb[2].mxu0 %vm2072_vm1, %v1164_v4  ;;  %1478 = vmatmul.mubr.msk.f32.vlgmr.msra.gmra.mrb[2].mxu1 %vm2073_vm2, %v1164_v4 }
 0x525   : > { %v1196_v9 = vpop.permute.xlu1 %1195 }
 0x5eb   : > { %v1267_v7 = vpop.f32.mrb[2].mxu0  ;;  %v1338_v11 = vpop.f32.mrb[2].mxu1 }
 0x5ec   : > { %v1268_v12 = vadd.f32 %v1267_v7, %v1196_v9  ;;  %v1339_v36 = vadd.f32 %v1338_v11, %v1196_v9  ;;  %v1269_v35 = vpop.f32.mrb[3].mxu0  ;;  %v1479_v13 = vpop.f32.mrb[3].mxu1 }
 0x5ed   : > { %v1270_v15 = vadd.f32 %v1269_v35, %v1196_v9 }
 0x5ee   : > { %1342 = vst [vmem:[%s278_s13] sm:$0xff] %v1268_v12  ;;  %1344 = vst [vmem:[%s278_s13 + $0x10] sm:$0xff] %v1339_v36 }
 0x5ef   : > { %1343 = vst [vmem:[%s278_s13 + $0x8] sm:$0xff] %v1270_v15 }
 0x5f0 PF: > { %s17_s24 = sadd.s32 1, %s1714_s24  }
 0x5f1   : > { %p14_p4 = scmp.ge.s32.totalorder %s17_s24, 4  }
 0x5f3   :  { %16 = sbr.rel (!%p14_p4) target bundleno = 1 (0x1), region = 78 }

</bundles_post_ra>
